<compile_context>
chip_gen: v7x
topology: tpu7x:2x2x1
jax: 0.10.0
libtpu: 0.0.40
codegen_flags: <defaults>
</compile_context>

<pallas_src>
import functools

import jax
import jax.numpy as jnp
from jax.experimental import pallas as pl
from jax.experimental.pallas import tpu as pltpu


# ---------------------------------------------------------------------------
# Pass 1: global avg/max pooling + shared MLP -> per-(batch, channel) weights.
# ---------------------------------------------------------------------------
def pool_mlp_kernel(x_ref, w1t_ref, b1_ref, w2t_ref, b2_ref, w_out_ref,
                    sum_acc, max_acc, *, hw, thw):
    t = pl.program_id(1)

    @pl.when(t == 0)
    def _():
        sum_acc[...] = jnp.zeros_like(sum_acc)
        max_acc[...] = jnp.full_like(max_acc, -jnp.inf)

    x = x_ref[...].astype(jnp.float32)                       # (C, THW) tile

    # Zero padding is neutral for the sum; only the max needs masking, and the
    # mask is all-true on every tile except the last padded one.
    if hw % thw != 0:
        lane = jax.lax.broadcasted_iota(jnp.int32, x.shape, 1) + t * thw
        x_max = jnp.where(lane < hw, x, -jnp.inf)
    else:
        x_max = x

    sum_acc[...] += jnp.sum(x, axis=-1, keepdims=True)                      # (C, 1)
    max_acc[...] = jnp.maximum(max_acc[...],
                               jnp.max(x_max, axis=-1, keepdims=True))      # (C, 1)

    @pl.when(t == pl.num_programs(1) - 1)
    def _():
        avg = sum_acc[...] * (1.0 / hw)                                     # (C, 1)
        pooled = jnp.concatenate([avg, max_acc[...]], axis=1)               # (C, 2)
        # Channel-major shared MLP (no transposes, one MXU push per layer).
        h = jnp.dot(w1t_ref[...], pooled,
                    preferred_element_type=jnp.float32) + b1_ref[...]       # (Ch, 2)
        h = jnp.maximum(h, 0.0)                                             # ReLU
        o = jnp.dot(w2t_ref[...], h,
                    preferred_element_type=jnp.float32) + b2_ref[...]       # (C, 2)
        # Sigmoid is inside the shared MLP => sum of two sigmoids (matches torch).
        w_out_ref[...] = jax.nn.sigmoid(o[:, 0:1]) + jax.nn.sigmoid(o[:, 1:2])


# ---------------------------------------------------------------------------
# Pass 2: broadcast per-channel weights over the spatial axis and scale.
# ---------------------------------------------------------------------------
def scale_kernel(x_ref, w_ref, o_ref):
    # (Bt, C, THW) * (Bt, C, 1) -> lane-broadcast multiply, no f32 copy of x.
    o_ref[...] = x_ref[...] * w_ref[...].astype(x_ref.dtype)


def channel_attention(x, w1, b1, w2, b2, *, block_bytes=4 * 1024 * 1024):
    """x: (B, C, H, W). w1: (C, Ch), b1: (Ch,), w2: (Ch, C), b2: (C,)."""
    B, C, H, W = x.shape
    HW = H * W
    Ch = w1.shape[1]
    dsize = x.dtype.itemsize

    # ---- pick a lane-dense spatial tile (multiple of 128, ~block_bytes) ----
    hw_pad = pl.cdiv(HW, 128) * 128
    n128 = hw_pad // 128
    d_tile = 1
    for d in range(1, n128 + 1):
        if n128 % d == 0 and d * 128 * C * dsize <= block_bytes:
            d_tile = d
    thw = d_tile * 128
    n_hw_tiles = hw_pad // thw

    # ---- how many batch elements per scale-kernel block --------------------
    per_b_bytes = C * thw * dsize
    bt = 1
    for d in range(1, B + 1):
        if B % d == 0 and d * per_b_bytes <= block_bytes:
            bt = d

    x_flat = x.reshape(B, C, HW)
    if hw_pad != HW:
        x_flat = jnp.pad(x_flat, ((0, 0), (0, 0), (0, hw_pad - HW)))

    # Channel-major MLP parameters (transposed once, outside the kernel).
    w1t = w1.T                        # (Ch, C)  lane-dense along C
    w2t = w2.T                        # (C, Ch)
    b1c = b1.reshape(Ch, 1)
    b2c = b2.reshape(C, 1)

    # Pass-2 peak VMEM: double-buffered x block + double-buffered out block.
    vmem_limit = max(32 * 1024 * 1024, 6 * bt * per_b_bytes)

    # ----------------------- pass 1: pool + MLP -----------------------------
    pool_cost = pl.CostEstimate(
        flops=3 * B * C * HW + 4 * B * C * Ch,
        transcendentals=2 * B * C,
        bytes_accessed=B * C * hw_pad * dsize + B * C * 4,
    )
    weights = pl.pallas_call(
        functools.partial(pool_mlp_kernel, hw=HW, thw=thw),
        out_shape=jax.ShapeDtypeStruct((B, C, 1), jnp.float32),
        grid_spec=pltpu.PrefetchScalarGridSpec(
            num_scalar_prefetch=0,
            grid=(B, n_hw_tiles),
            in_specs=[
                pl.BlockSpec((None, C, thw), lambda b, t: (b, 0, t)),   # x tile
                pl.BlockSpec((Ch, C), lambda b, t: (0, 0)),             # w1t
                pl.BlockSpec((Ch, 1), lambda b, t: (0, 0)),             # b1
                pl.BlockSpec((C, Ch), lambda b, t: (0, 0)),             # w2t
                pl.BlockSpec((C, 1), lambda b, t: (0, 0)),              # b2
            ],
            out_specs=pl.BlockSpec((None, C, 1), lambda b, t: (b, 0, 0)),
            scratch_shapes=[
                pltpu.VMEM((C, 1), jnp.float32),   # running sum
                pltpu.VMEM((C, 1), jnp.float32),   # running max
            ],
        ),
        compiler_params=pltpu.CompilerParams(
            dimension_semantics=("parallel", "arbitrary"),
            vmem_limit_bytes=vmem_limit,
        ),
        cost_estimate=pool_cost,
    )(x_flat, w1t, b1c, w2t, b2c)

    # ----------------------- pass 2: tiled scale ----------------------------
    scale_cost = pl.CostEstimate(
        flops=B * C * hw_pad,
        transcendentals=0,
        bytes_accessed=2 * B * C * hw_pad * dsize + B * C * 4,
    )
    out_flat = pl.pallas_call(
        scale_kernel,
        out_shape=jax.ShapeDtypeStruct((B, C, hw_pad), x.dtype),
        grid_spec=pltpu.PrefetchScalarGridSpec(
            num_scalar_prefetch=0,
            grid=(B // bt, n_hw_tiles),
            in_specs=[
                pl.BlockSpec((bt, C, thw), lambda bi, ti: (bi, 0, ti)),
                pl.BlockSpec((bt, C, 1), lambda bi, ti: (bi, 0, 0)),
            ],
            out_specs=pl.BlockSpec((bt, C, thw), lambda bi, ti: (bi, 0, ti)),
        ),
        compiler_params=pltpu.CompilerParams(
            dimension_semantics=("parallel", "parallel"),
            vmem_limit_bytes=vmem_limit,
        ),
        cost_estimate=scale_cost,
    )(x_flat, weights)

    if hw_pad != HW:
        out_flat = out_flat[:, :, :HW]
    return out_flat.reshape(B, C, H, W)


def channel_attention_ref(x, w1, b1, w2, b2):
    """Pure-JAX reference mirroring the PyTorch forward."""
    avg = jnp.mean(x, axis=(2, 3))          # (B, C)
    mx = jnp.max(x, axis=(2, 3))            # (B, C)

    def mlp(v):
        h = jnp.maximum(v @ w1 + b1, 0.0)
        return jax.nn.sigmoid(h @ w2 + b2)

    weights = mlp(avg) + mlp(mx)            # (B, C)
    return x * weights[:, :, None, None]


def _run_case(key, B, C, H, W, reduction):
    Ch = max(1, C // reduction)
    kx, k1, k2, k3, k4 = jax.random.split(key, 5)
    x = jax.random.normal(kx, (B, C, H, W), dtype=jnp.float32)
    w1 = jax.random.normal(k1, (C, Ch), dtype=jnp.float32) * (1.0 / jnp.sqrt(C))
    b1 = jax.random.normal(k2, (Ch,), dtype=jnp.float32) * 0.1
    w2 = jax.random.normal(k3, (Ch, C), dtype=jnp.float32) * (1.0 / jnp.sqrt(Ch))
    b2 = jax.random.normal(k4, (C,), dtype=jnp.float32) * 0.1

    out = jax.block_until_ready(channel_attention(x, w1, b1, w2, b2))
    ref = channel_attention_ref(x, w1, b1, w2, b2)
    assert out.shape == (B, C, H, W)
    assert jnp.allclose(out, ref, atol=1e-5, rtol=1e-5), (
        f"mismatch vs reference for shape {(B, C, H, W)}")


if __name__ == "__main__":
    key = jax.random.PRNGKey(0)
    k_a, k_b = jax.random.split(key, 2)

    # Small shapes consistent with the module (HW is a multiple of 128).
    _run_case(k_a, B=2, C=32, H=16, W=16, reduction=16)
    # Ragged spatial size (HW = 81 -> padded to 128) to exercise masked max-pool.
    _run_case(k_b, B=2, C=16, H=9, W=9, reduction=4)

    print("KERNEL_OK")
</pallas_src>

<mosaic_0001>
module attributes {stable_mosaic.version = 11 : i64} {
  func.func @pool_mlp_kernel(%arg0: i32, %arg1: i32, %arg2: memref<1x32x256xf32, #tpu.memory_space<vmem>>, %arg3: memref<2x32xf32, #tpu.memory_space<vmem>>, %arg4: memref<2x1xf32, #tpu.memory_space<vmem>>, %arg5: memref<32x2xf32, #tpu.memory_space<vmem>>, %arg6: memref<32x1xf32, #tpu.memory_space<vmem>>, %arg7: memref<1x32x1xf32, #tpu.memory_space<vmem>>, %arg8: memref<32x1xf32, #tpu.memory_space<vmem>>, %arg9: memref<32x1xf32, #tpu.memory_space<vmem>>) attributes {dimension_semantics = [#tpu.dimension_semantics<parallel>, #tpu.dimension_semantics<arbitrary>], iteration_bounds = array<i64: 2, 1>, scalar_prefetch = 0 : i64, scratch_operands = 2 : i64, tpu.core_type = #tpu.core_type<tc>, window_params = [{transform_indices = @transform_0, window_bounds = array<i64: 1, 32, 256>}, {pipeline_mode = #tpu.pipeline_mode<synchronous>, transform_indices = @transform_1, window_bounds = array<i64: 2, 32>}, {pipeline_mode = #tpu.pipeline_mode<synchronous>, transform_indices = @transform_2, window_bounds = array<i64: 2, 1>}, {pipeline_mode = #tpu.pipeline_mode<synchronous>, transform_indices = @transform_3, window_bounds = array<i64: 32, 2>}, {pipeline_mode = #tpu.pipeline_mode<synchronous>, transform_indices = @transform_4, window_bounds = array<i64: 32, 1>}, {transform_indices = @transform_5, window_bounds = array<i64: 1, 32, 1>}]} {
    %c0_i32 = arith.constant 0 : i32
    %0 = arith.cmpi eq, %arg1, %c0_i32 : i32
    %1 = arith.extui %0 : i1 to i32
    %c0_i32_0 = arith.constant 0 : i32
    %2 = arith.cmpi ne, %1, %c0_i32_0 : i32
    scf.if %2 {
      %cst_14 = arith.constant 0.000000e+00 : f32
      %18 = vector.broadcast %cst_14 : f32 to vector<32x1xf32>
      %c0_15 = arith.constant 0 : index
      %c0_16 = arith.constant 0 : index
      %19 = vector.load %arg8[%c0_15, %c0_16] : memref<32x1xf32, #tpu.memory_space<vmem>>, vector<32x1xf32>
      tpu.vector_store %arg8[%c0_15, %c0_16], %18 {strides = array<i32>} : memref<32x1xf32, #tpu.memory_space<vmem>>, vector<32x1xf32>,
      %cst_17 = arith.constant 0xFF800000 : f32
      %20 = vector.broadcast %cst_17 : f32 to vector<32x1xf32>
      %c0_18 = arith.constant 0 : index
      %c0_19 = arith.constant 0 : index
      %21 = vector.load %arg9[%c0_18, %c0_19] : memref<32x1xf32, #tpu.memory_space<vmem>>, vector<32x1xf32>
      tpu.vector_store %arg9[%c0_18, %c0_19], %20 {strides = array<i32>} : memref<32x1xf32, #tpu.memory_space<vmem>>, vector<32x1xf32>,
    } else {
    }
    %c0 = arith.constant 0 : index
    %c0_1 = arith.constant 0 : index
    %c0_2 = arith.constant 0 : index
    %3 = vector.load %arg2[%c0, %c0_1, %c0_2] : memref<1x32x256xf32, #tpu.memory_space<vmem>>, vector<1x32x256xf32>
    %4 = vector.shape_cast %3 : vector<1x32x256xf32> to vector<32x256xf32>
    %c0_3 = arith.constant 0 : index
    %c0_4 = arith.constant 0 : index
    %5 = vector.load %arg8[%c0_3, %c0_4] : memref<32x1xf32, #tpu.memory_space<vmem>>, vector<32x1xf32>
    %cst = arith.constant dense<0.000000e+00> : vector<32xf32>
    %6 = vector.multi_reduction <add>, %4, %cst [1] : vector<32x256xf32> to vector<32xf32>
    %7 = vector.shape_cast %6 : vector<32xf32> to vector<32x1xf32>
    %8 = arith.addf %5, %7 : vector<32x1xf32>
    %c0_5 = arith.constant 0 : index
    %c0_6 = arith.constant 0 : index
    %9 = vector.load %arg8[%c0_5, %c0_6] : memref<32x1xf32, #tpu.memory_space<vmem>>, vector<32x1xf32>
    tpu.vector_store %arg8[%c0_5, %c0_6], %8 {strides = array<i32>} : memref<32x1xf32, #tpu.memory_space<vmem>>, vector<32x1xf32>,
    %c0_7 = arith.constant 0 : index
    %c0_8 = arith.constant 0 : index
    %10 = vector.load %arg9[%c0_7, %c0_8] : memref<32x1xf32, #tpu.memory_space<vmem>>, vector<32x1xf32>
    %cst_9 = arith.constant dense<0xFF800000> : vector<32xf32>
    %11 = vector.multi_reduction <maximumf>, %4, %cst_9 [1] : vector<32x256xf32> to vector<32xf32>
    %12 = vector.shape_cast %11 : vector<32xf32> to vector<32x1xf32>
    %13 = arith.maximumf %10, %12 : vector<32x1xf32>
    %c0_10 = arith.constant 0 : index
    %c0_11 = arith.constant 0 : index
    %14 = vector.load %arg9[%c0_10, %c0_11] : memref<32x1xf32, #tpu.memory_space<vmem>>, vector<32x1xf32>
    tpu.vector_store %arg9[%c0_10, %c0_11], %13 {strides = array<i32>} : memref<32x1xf32, #tpu.memory_space<vmem>>, vector<32x1xf32>,
    %c0_i32_12 = arith.constant 0 : i32
    %15 = arith.cmpi eq, %arg1, %c0_i32_12 : i32
    %16 = arith.extui %15 : i1 to i32
    %c0_i32_13 = arith.constant 0 : i32
    %17 = arith.cmpi ne, %16, %c0_i32_13 : i32
    scf.if %17 {
      %c0_14 = arith.constant 0 : index
      %c0_15 = arith.constant 0 : index
      %18 = vector.load %arg8[%c0_14, %c0_15] : memref<32x1xf32, #tpu.memory_space<vmem>>, vector<32x1xf32>
      %cst_16 = arith.constant 3.906250e-03 : f32
      %19 = vector.broadcast %cst_16 : f32 to vector<32x1xf32>
      %20 = arith.mulf %18, %19 : vector<32x1xf32>
      %c0_17 = arith.constant 0 : index
      %c0_18 = arith.constant 0 : index
      %21 = vector.load %arg9[%c0_17, %c0_18] : memref<32x1xf32, #tpu.memory_space<vmem>>, vector<32x1xf32>
      %22 = tpu.concatenate %20, %21 in 1 : vector<32x1xf32>, vector<32x1xf32> -> vector<32x2xf32>
      %c0_19 = arith.constant 0 : index
      %c0_20 = arith.constant 0 : index
      %23 = vector.load %arg3[%c0_19, %c0_20] : memref<2x32xf32, #tpu.memory_space<vmem>>, vector<2x32xf32>
      %cst_21 = arith.constant dense<0.000000e+00> : vector<2x2xf32>
      %24 = tpu.matmul %23, %22, %cst_21 {dimension_numbers = #tpu.dot_dimension_numbers<[1], [0], [0], [1], [0, 0, 1, 1], [], []>} : vector<2x32xf32>, vector<32x2xf32>, vector<2x2xf32> -> vector<2x2xf32>
      %c0_22 = arith.constant 0 : index
      %c0_23 = arith.constant 0 : index
      %25 = vector.load %arg4[%c0_22, %c0_23] : memref<2x1xf32, #tpu.memory_space<vmem>>, vector<2x1xf32>
      %26 = vector.broadcast %25 : vector<2x1xf32> to vector<2x2xf32>
      %27 = arith.addf %24, %26 : vector<2x2xf32>
      %cst_24 = arith.constant 0.000000e+00 : f32
      %28 = vector.broadcast %cst_24 : f32 to vector<2x2xf32>
      %29 = arith.maximumf %27, %28 : vector<2x2xf32>
      %c0_25 = arith.constant 0 : index
      %c0_26 = arith.constant 0 : index
      %30 = vector.load %arg5[%c0_25, %c0_26] : memref<32x2xf32, #tpu.memory_space<vmem>>, vector<32x2xf32>
      %cst_27 = arith.constant dense<0.000000e+00> : vector<32x2xf32>
      %31 = tpu.matmul %30, %29, %cst_27 {dimension_numbers = #tpu.dot_dimension_numbers<[1], [0], [0], [1], [0, 0, 1, 1], [], []>} : vector<32x2xf32>, vector<2x2xf32>, vector<32x2xf32> -> vector<32x2xf32>
      %c0_28 = arith.constant 0 : index
      %c0_29 = arith.constant 0 : index
      %32 = vector.load %arg6[%c0_28, %c0_29] : memref<32x1xf32, #tpu.memory_space<vmem>>, vector<32x1xf32>
      %33 = vector.broadcast %32 : vector<32x1xf32> to vector<32x2xf32>
      %34 = arith.addf %31, %33 : vector<32x2xf32>
      %35 = vector.extract_strided_slice %34 {offsets = [0, 0], sizes = [32, 1], strides = [1, 1]} : vector<32x2xf32> to vector<32x1xf32>
      %36 = arith.negf %35 : vector<32x1xf32>
      %37 = math.exp %36 : vector<32x1xf32>
      %cst_30 = arith.constant 1.000000e+00 : f32
      %38 = vector.broadcast %cst_30 : f32 to vector<32x1xf32>
      %39 = arith.addf %38, %37 : vector<32x1xf32>
      %40 = arith.divf %38, %39 : vector<32x1xf32>
      %41 = vector.extract_strided_slice %34 {offsets = [0, 1], sizes = [32, 1], strides = [1, 1]} : vector<32x2xf32> to vector<32x1xf32>
      %42 = arith.negf %41 : vector<32x1xf32>
      %43 = math.exp %42 : vector<32x1xf32>
      %cst_31 = arith.constant 1.000000e+00 : f32
      %44 = vector.broadcast %cst_31 : f32 to vector<32x1xf32>
      %45 = arith.addf %44, %43 : vector<32x1xf32>
      %46 = arith.divf %44, %45 : vector<32x1xf32>
      %47 = arith.addf %40, %46 : vector<32x1xf32>
      %c0_32 = arith.constant 0 : index
      %c0_33 = arith.constant 0 : index
      %c0_34 = arith.constant 0 : index
      %48 = vector.load %arg7[%c0_32, %c0_33, %c0_34] : memref<1x32x1xf32, #tpu.memory_space<vmem>>, vector<1x32x1xf32>
      %49 = vector.shape_cast %48 : vector<1x32x1xf32> to vector<32x1xf32>
      %50 = vector.shape_cast %47 : vector<32x1xf32> to vector<1x32x1xf32>
      tpu.vector_store %arg7[%c0_32, %c0_33, %c0_34], %50 {strides = array<i32>} : memref<1x32x1xf32, #tpu.memory_space<vmem>>, vector<1x32x1xf32>,
    } else {
    }
    return
  }
  func.func @transform_0(%arg0: i32, %arg1: i32) -> (i32, i32, i32) {
    %c0_i32 = arith.constant 0 : i32
    %c0_i32_0 = arith.constant 0 : i32
    return %arg0, %c0_i32, %arg1 : i32, i32, i32
  }
  func.func @transform_1(%arg0: i32, %arg1: i32) -> (i32, i32) {
    %c0_i32 = arith.constant 0 : i32
    %c0_i32_0 = arith.constant 0 : i32
    %c0_i32_1 = arith.constant 0 : i32
    return %c0_i32, %c0_i32_0 : i32, i32
  }
  func.func @transform_2(%arg0: i32, %arg1: i32) -> (i32, i32) {
    %c0_i32 = arith.constant 0 : i32
    %c0_i32_0 = arith.constant 0 : i32
    %c0_i32_1 = arith.constant 0 : i32
    return %c0_i32, %c0_i32_0 : i32, i32
  }
  func.func @transform_3(%arg0: i32, %arg1: i32) -> (i32, i32) {
    %c0_i32 = arith.constant 0 : i32
    %c0_i32_0 = arith.constant 0 : i32
    %c0_i32_1 = arith.constant 0 : i32
    return %c0_i32, %c0_i32_0 : i32, i32
  }
  func.func @transform_4(%arg0: i32, %arg1: i32) -> (i32, i32) {
    %c0_i32 = arith.constant 0 : i32
    %c0_i32_0 = arith.constant 0 : i32
    %c0_i32_1 = arith.constant 0 : i32
    return %c0_i32, %c0_i32_0 : i32, i32
  }
  func.func @transform_5(%arg0: i32, %arg1: i32) -> (i32, i32, i32) {
    %c0_i32 = arith.constant 0 : i32
    %c0_i32_0 = arith.constant 0 : i32
    %c0_i32_1 = arith.constant 0 : i32
    return %arg0, %c0_i32, %c0_i32_0 : i32, i32, i32
  }
}

</mosaic_0001>

<bundles_post_ra>
// kernel: tpu_custom_call.1
= control target key start
LH: loop header
LB: loop body
LE: loop exit
PB: predicated region body
PF: predicated region fallthrough
CT: control target
= control target key end

     0   :  { %10 = vsyncpa [#allocation5], 0  ;;  %s1161_s0 = inlined_call_operand.hbm [shape: f32[2,32,256], index: 0, kind: input, shape index: {}]   ;;  %s1162_s1 = inlined_call_operand.vmem [shape: f32[2,32], index: 1, kind: input, shape index: {}]   ;;  %s1163_s2 = inlined_call_operand.vmem [shape: f32[2,1], index: 2, kind: input, shape index: {}]   ;;  %s1164_s3 = inlined_call_operand.vmem [shape: f32[32,2], index: 3, kind: input, shape index: {}]   ;;  %s1165_s4 = inlined_call_operand.vmem [shape: f32[32,1], index: 4, kind: input, shape index: {}]   ;;  %s1166_s5 = inlined_call_operand.vmem [shape: f32[2,32,1], index: 5, kind: output, shape index: {}]  }
   0x1   :  { %12 = vsyncpa [#allocation5 + $0x1], 0  ;;  %s979_s18 = smov 0   ;;  %s981_s19 = smov 0  }
   0x2   :  { %s983_s20 = smov 0   ;;  %s985_s21 = smov 0  }
   0x3   :  { %s987_s22 = smov 0   ;;  %s989_s23 = smov 0  }
   0x4 LB: > { %s705_s24 = sadd.s32 4294967295, %s937_s23   ;;  %s30_s25 = sadd.s32 1, %s933_s22  ;;  %s937_s23 = sphi %s989_s23, %s18_s23   ;;  %s933_s22 = sphi %s987_s22, %s1174_s22   ;;  %s929_s21 = sphi %s985_s21, %s1173_s21   ;;  %s925_s20 = sphi %s983_s20, %s1172_s20   ;;  %s921_s19 = sphi %s981_s19, %s1171_s19   ;;  %s917_s18 = sphi %s979_s18, %s1170_s18  }
   0x5   : > { %p32_p0 = scmp.ge.s32.totalorder %s30_s25, 2  ;;  %s39_s26 = sadd.s32 1, %s925_s20 }
   0x6   : > { %p46_p1 = scmp.ne.s32.totalorder %s925_s20, %s921_s19  ;;  %p47_p2 = scmp.eq.s32.totalorder %s937_s23, 0 }
   0x7   : > { %s1176_s25 = smov (%p32_p0, %s30_s25), 0  ;;  %p52_p4 = scmp.ne.s32.totalorder %s921_s19, %s917_s18 }
   0x8   : > { %p1015_p3 = por %p47_p2, %p46_p1  ;;  %s34_s28 = ssub.s32 %s933_s22, %s1176_s25 }
   0x9   : > { %p53_p5 = scmp.eq.s32.totalorder %s705_s24, 0  ;;  %p37_p6 = scmp.eq.s32.totalorder %s34_s28, 0 }
   0xa   : > { %p771_p8 = scmp.lt.s32.totalorder %s937_s23, 2  ;;  %s198_s6 = sand.u32 1, %s925_s20  }
   0xb   : > { %p1022_p7 = por %p53_p5, %p52_p4  ;;  %s728_s7 = sshll.u32 %s933_s22, 10 }
   0xc   : > { %s1028_s30 = scalar_select %p37_p6, %s925_s20, %s39_s26  }
   0xd   : > { %s709_s8 = sshll.u32 %s198_s6, 6  ;;  %s1035_s11 = scalar_lea.hbm %s1161_s0, %s728_s7 }
   0xe   : > { %s202_s12 = scalar_lea.vmem [#allocation4], %s709_s8  ;;  %p1039_p9 = pnand %p771_p8, %p1015_p3 }
   0xf   : > { %s211_s13 = sshll.u32 %s202_s12, 4  ;;  %s1045_s15 = scalar_lea.sflag [#allocation5], %s198_s6  ;;  %s1043_s13 = int_to_ptr.vmem [resolvable:$true] %s211_s13 }
  0x10   : > { %s857_s16 = scalar_lea.hbm %s1035_s11, 1024  ;;  %p859_p11 = pneg %p1039_p9 }
  0x11   : > { %p858_p10 = scmp.ne.s32.totalorder %s1035_s11, %s857_s16  ;;  %s862_s24 = scalar_lea.hbm %s1161_s0, 2048 }
  0x12   : > { %p863_p0 = scmp.lt.u32.totalorder %s1035_s11, %s1161_s0  ;;  %p864_p1 = scmp.lt.u32.totalorder %s862_s24, %s857_s16 }
  0x13   : > { %p860_p12 = pnand %p859_p11, %p858_p10  ;;  %p866_p3 = scmp.lt.u32.totalorder %s857_s16, %s1035_s11 }
  0x14   : > { %p865_p2 = por %p864_p1, %p863_p0 }
  0x15   : > { %p861_p13 = pneg %p860_p12 }
  0x16   : > { %p867_p4 = por %p866_p3, %p865_p2 }
  0x18   : > { %p868_p5 = pnand %p867_p4, %p861_p13 }
  0x1a   : > { %871 = shalt.err (!%p868_p5)
}
  0x1b   : > { %s872_s28 = scalar_lea.vmem %s1043_s13, 1024  ;;  %s939_s6 = smov [#allocation4]  }
  0x1c   : > { %p873_p6 = scmp.ne.s32.totalorder %s1043_s13, %s872_s28  ;;  %s877_s7 = sshll.u32 %s939_s6, 4  ;;  %s878_s7 = int_to_ptr.vmem [resolvable:$false] %s877_s7 }
  0x1d   : > { %s879_s8 = scalar_lea.vmem %s878_s7, 2048  ;;  %p880_p12 = scmp.lt.s32.totalorder %s1043_s13, %s878_s7 }
  0x1e   : > { %p875_p8 = pnand %p873_p6, %p859_p11  ;;  %p881_p0 = scmp.lt.s32.totalorder %s879_s8, %s872_s28 }
  0x20   : > { %p876_p10 = pneg %p875_p8  ;;  %p882_p1 = por %p881_p0, %p880_p12 }
  0x22   : > { %p883_p2 = pnand %p882_p1, %p876_p10 }
  0x24   : > { %886 = shalt.err (!%p883_p2)
}
  0x25   : > { %s940_s9 = smov 256   ;;  %s941_s10 = smov 16  }
  0x26   : > { %770 = dma.hbm_to_vmem [thread:$0]  (!%p1039_p9), %s1035_s11, 1024, %s1043_s13, %s1045_s15, %s940_s9, %s940_s9, %s941_s10  }
  0x27   : > { %p712_p11 = scmp.ge.s32.totalorder %s937_s23, 1  ;;  %p219_p13 = scmp.lt.s32.totalorder %s937_s23, 3 }
  0x29   : > { %p220_p3 = pnand %p712_p11, %p219_p13 }
  0x2a   : > { %s225_s12 = sand.u32 (!%p220_p3), 1, %s921_s19  }
  0x2b   : > { %223 = sbr.rel (%p220_p3) target bundleno = 921 (0x399), region = 40  ;;  %s713_s16 = sshll.u32 (!%p220_p3), %s225_s12, 6 }
  0x2c   : > { %s226_s17 = scalar_lea.sflag (!%p220_p3), [#allocation5], %s225_s12  ;;  %s229_s18 = scalar_lea.vmem (!%p220_p3), [#allocation4], %s713_s16 }
  0x32   : > { %912 = dma.done.wait (%p1022_p7), %s226_s17, 1024  }
  0x33   : > { %914 = vsyncadd (%p1022_p7), %s226_s17, 4294966272  ;;  %vm266_vm0 = vcmask 7168   ;;  %v942_v0 = vmov -inf   ;;  %v279_v1 = vld [vmem:[%s229_s18 + $0x20] sm:$0xff]  ;;  %v280_v2 = vld [vmem:[%s229_s18 + $0x28] sm:$0xff]  ;;  %v943_v17 = vmov 0.0  }
  0x34   : > { %273 = vst.msk [vmem:[#allocation3 + $0x10] sm:$0xff] %vm266_vm0, %v942_v0  ;;  %271 = vst.msk [vmem:[#allocation3] sm:$0xff] %vm266_vm0, %v942_v0  ;;  %v275_v3 = vld [vmem:[%s229_s18] sm:$0xff]  ;;  %v318_v4 = vmax.f32 %v279_v1, %v280_v2  ;;  %v276_v5 = vld [vmem:[%s229_s18 + $0x8] sm:$0xff]  ;;  %v293_v16 = vadd.f32 %v280_v2, %v279_v1  ;;  %v944_v31 = vmov 0.0|0.0   ;;  %vm945_vm1 = vmmov 0  }
  0x35   : > { %272 = vst.msk [vmem:[#allocation3 + $0x8] sm:$0xff] %vm266_vm0, %v942_v0  ;;  %274 = vst.msk [vmem:[#allocation3 + $0x18] sm:$0xff] %vm266_vm0, %v942_v0  ;;  %v281_v6 = vld [vmem:[%s229_s18 + $0x30] sm:$0xff]  ;;  %v282_v7 = vld [vmem:[%s229_s18 + $0x38] sm:$0xff]  ;;  %v312_v8 = vmax.f32 %v275_v3, %v276_v5  ;;  %v287_v14 = vadd.f32 %v276_v5, %v275_v3  ;;  %759 = vmatprep.subr.bf16.mxu0 %v944_v31  ;;  %748 = vmatprep.mubr.msk.f32.mxu0 %vm945_vm1, %v943_v17  ;;  %s946_s29 = smov 1   ;;  %v947_v49 = vmov 0  }
  0x36   : > { %v277_v9 = vld [vmem:[%s229_s18 + $0x10] sm:$0xff]  ;;  %v278_v10 = vld [vmem:[%s229_s18 + $0x18] sm:$0xff]  ;;  %319 = vmax.xlane.f32.xlu1 %v318_v4  ;;  %v321_v11 = vmax.f32 %v281_v6, %v282_v7  ;;  %v296_v15 = vadd.f32 %v282_v7, %v281_v6  ;;  %268 = vst.msk [vmem:[#allocation2 + $0x8] sm:$0xff] %vm266_vm0, %v943_v17  ;;  %267 = vst.msk [vmem:[#allocation2] sm:$0xff] %vm266_vm0, %v943_v17  ;;  %840 = vset.pattern.permute.xlu0 %v947_v49  ;;  %vm374_vm2 = vcmask 261120   ;;  %vm477_vm3 = vcmask 15360  }
  0x37   : > { %313 = vmax.xlane.f32.xlu0 %v312_v8  ;;  %v315_v12 = vmax.f32 %v277_v9, %v278_v10  ;;  %v290_v13 = vadd.f32 %v278_v10, %v277_v9  ;;  %269 = vst.msk [vmem:[#allocation2 + $0x10] sm:$0xff] %vm266_vm0, %v943_v17  ;;  %270 = vst.msk [vmem:[#allocation2 + $0x18] sm:$0xff] %vm266_vm0, %v943_v17  ;;  %839 = vset.pattern.permute.xlu1 %v947_v49  ;;  %v368_v50 = vld [vmem:[%s1163_s2] sm:$0x3]  ;;  %v455_v52 = vld [vmem:[%s1165_s4 + $0x10] sm:$0xff]  ;;  %vm490_vm4 = vcmask 1041408  }
  0x38   : > { %v453_v51 = vld [vmem:[%s1165_s4] sm:$0xff]  ;;  %v456_v53 = vld [vmem:[%s1165_s4 + $0x18] sm:$0xff]  ;;  %s948_s14 = smov 127   ;;  %p257_p7 = scmp.lt.s32.totalorder %s929_s21, 1 }
  0x39   : > { %v367_v10 = vld [vmem:[%s1162_s1] sm:$0x3] }
  0x3a   : > { %322 = vmax.xlane.f32.xlu1 %v321_v11  ;;  %v449_v11 = vld [vmem:[%s1164_s3] sm:$0xff]  ;;  %s1178_s21 = smov (!%p257_p7, %s929_s21), 1 }
  0x3b   : > { %316 = vmax.xlane.f32.xlu0 %v315_v12  ;;  %v310_v18 = vld [vmem:[#allocation3 + $0x10] sm:$0xff]  ;;  %v308_v19 = vld [vmem:[#allocation3] sm:$0xff]  ;;  %753 = vmatprep.mubr.msk.f32.mxu1 %vm477_vm3, %v449_v11  ;;  %v454_v12 = vld [vmem:[%s1165_s4 + $0x8] sm:$0xff]  ;;  %s729_s15 = sshll.u32 %s1178_s21, 5 }
  0x3c   : > { %v311_v24 = vld [vmem:[#allocation3 + $0x18] sm:$0xff]  ;;  %v309_v25 = vld [vmem:[#allocation3 + $0x8] sm:$0xff]  ;;  %s261_s27 = scalar_lea.vmem %s1166_s5, %s729_s15 }
  0x3d   : > { %v284_v30 = vld [vmem:[#allocation2 + $0x8] sm:$0xff]  ;;  %v283_v32 = vld [vmem:[#allocation2] sm:$0xff] }
  0x3e   : > { %291 = vadd.xlane.f32.xlu1 %v290_v13  ;;  %v286_v37 = vld [vmem:[#allocation2 + $0x18] sm:$0xff]  ;;  %v285_v38 = vld [vmem:[#allocation2 + $0x10] sm:$0xff] }
  0x3f   : > { %288 = vadd.xlane.f32.xlu0 %v287_v14 }
  0x42   : > { %297 = vadd.xlane.f32.xlu1 %v296_v15 }
  0x43   : > { %294 = vadd.xlane.f32.xlu0 %v293_v16 }
  0xc3   : > { %v320_v20 = vpop.xlane.xlu1 %319 }
  0xc4   : > { %v326_v21 = vmax.f32 %v310_v18, %v320_v20  ;;  %v314_v22 = vpop.xlane.xlu0 %313  ;;  %v450_v18 = vld [vmem:[%s1164_s3 + $0x8] sm:$0xff]  ;;  %v452_v20 = vld [vmem:[%s1164_s3 + $0x18] sm:$0xff] }
  0xc5   : > { %v324_v23 = vmax.f32 %v308_v19, %v314_v22  ;;  %v451_v19 = vld [vmem:[%s1164_s3 + $0x10] sm:$0xff] }
  0xc6   : > { %330 = vst.msk [vmem:[#allocation3 + $0x10] sm:$0xff] %vm266_vm0, %v326_v21 }
  0xc7   : > { %328 = vst.msk [vmem:[#allocation3] sm:$0xff] %vm266_vm0, %v324_v23  ;;  %v323_v26 = vpop.xlane.xlu1 %322 }
  0xc8   : > { %v327_v27 = vmax.f32 %v311_v24, %v323_v26  ;;  %v317_v28 = vpop.xlane.xlu0 %316 }
  0xc9   : > { %v325_v29 = vmax.f32 %v309_v25, %v317_v28 }
  0xca   : > { %331 = vst.msk [vmem:[#allocation3 + $0x18] sm:$0xff] %vm266_vm0, %v327_v27 }
  0xcb   : > { %329 = vst.msk [vmem:[#allocation3 + $0x8] sm:$0xff] %vm266_vm0, %v325_v29  ;;  %v292_v33 = vpop.xlane.xlu1 %291 }
  0xcc   : > { %v300_v34 = vadd.f32 %v292_v33, %v284_v30  ;;  %v289_v35 = vpop.xlane.xlu0 %288 }
  0xcd   : > { %v299_v36 = vadd.f32 %v289_v35, %v283_v32  ;;  %v345_v39 = vld [vmem:[#allocation3 + $0x10] sm:$0xff] }
  0xce   : > { %305 = vst.msk [vmem:[#allocation2 + $0x8] sm:$0xff] %vm266_vm0, %v300_v34  ;;  %v343_v46 = vld [vmem:[#allocation3] sm:$0xff] }
  0xcf   : > { %304 = vst.msk [vmem:[#allocation2] sm:$0xff] %vm266_vm0, %v299_v36  ;;  %v298_v40 = vpop.xlane.xlu1 %297 }
  0xd0   : > { %v302_v41 = vadd.f32 %v298_v40, %v286_v37  ;;  %v295_v42 = vpop.xlane.xlu0 %294 }
  0xd1   : > { %v346_v43 = vld [vmem:[#allocation3 + $0x18] sm:$0xff]  ;;  %v301_v44 = vadd.f32 %v295_v42, %v285_v38 }
  0xd2   : > { %v834_v45 = vpack.i.bf16 %v346_v43, %v345_v39  ;;  %v344_v47 = vld [vmem:[#allocation3 + $0x8] sm:$0xff]  ;;  %307 = vst.msk [vmem:[#allocation2 + $0x18] sm:$0xff] %vm266_vm0, %v302_v41 }
  0xd3   : > { %v829_v48 = vpack.i.bf16 %v344_v47, %v343_v46  ;;  %306 = vst.msk [vmem:[#allocation2 + $0x10] sm:$0xff] %vm266_vm0, %v301_v44 }
  0xd4   : > { %835 = vrot.lane.b32.xlu1 %v834_v45, %s946_s29 }
  0xd5   : > { %830 = vrot.lane.b32.xlu0 %v829_v48, %s946_s29  ;;  %v336_v55 = vld [vmem:[#allocation2 + $0x8] sm:$0xff] }
  0xd6   : > { %v335_v54 = vld [vmem:[#allocation2] sm:$0xff]  ;;  %v340_v60 = vmul.f32 0.00390625, %v336_v55 }
  0xd7   : > { %v339_v59 = vmul.f32 0.00390625, %v335_v54 }
  0xd8   : > { %371 = vperm.xlu1 %839, %v368_v50  }
  0xd9   : > { %v338_v57 = vld [vmem:[#allocation2 + $0x18] sm:$0xff]  ;;  %464 = vperm.xlu0 %840, %v454_v12  }
  0xda   : > { %v337_v56 = vld [vmem:[#allocation2 + $0x10] sm:$0xff]  ;;  %v342_v63 = vmul.f32 0.00390625, %v338_v57 }
  0xdb   : > { %v341_v62 = vmul.f32 0.00390625, %v337_v56 }
  0xdc   : > { %459 = vperm.xlu1 %839, %v453_v51  }
  0xe0   : > { %469 = vperm.xlu1 %839, %v455_v52  }
  0xe4   : > { %474 = vperm.xlu1 %839, %v456_v53  }
 0x146   : > { %v836_v58 = vpop.permute.xlu1 %835 }
 0x147   : > { %v831_v61 = vpop.permute.xlu0 %830  ;;  %v838_v0 = vunpack.i.h.bf16 %v836_v58  ;;  %v837_v1 = vunpack.i.l.bf16 %v836_v58 }
 0x148   : > { %v833_v2 = vunpack.i.h.bf16 %v831_v61  ;;  %v832_v3 = vunpack.i.l.bf16 %v831_v61 }
 0x149   : > { %v365_v7 = vsel %vm266_vm0, %v341_v62, %v837_v1  ;;  %v366_v8 = vsel %vm266_vm0, %v342_v63, %v838_v0 }
 0x14a   : > { %v363_v4 = vsel %vm266_vm0, %v339_v59, %v832_v3  ;;  %v364_v5 = vsel %vm266_vm0, %v340_v60, %v833_v2  ;;  %v763_v9 = vpack.c.bf16 %v366_v8, %v365_v7 }
 0x14b   : > { %v760_v6 = vpack.c.bf16 %v364_v5, %v363_v4 }
 0x14d   : > { %761 = vmatpush3.bf16.msra.mxu0 %v760_v6 }
 0x14e   : > { %762 = vmatprep.subr.bf16.mxu0 %v944_v31 }
 0x151   : > { %764 = vmatpush3.bf16.msra.mxu0 %v763_v9 }
 0x154   : > { %749 = vmatmul.mubr.msk.f32.vlgmr.msra.gmra.mrb[0].mxu0 %vm374_vm2, %v367_v10 }
 0x157   : > { %v372_v13 = vpop.permute.xlu1 %371 }
 0x158   : > { %v465_v23 = vpop.permute.xlu0 %464 }
 0x15b   : > { %v460_v21 = vpop.permute.xlu1 %459 }
 0x15f   : > { %v470_v22 = vpop.permute.xlu1 %469 }
 0x163   : > { %v475_v29 = vpop.permute.xlu1 %474 }
 0x227   : > { %v444_v14 = vpop.f32.mrb[0].mxu0 }
 0x228   : > { %v445_v15 = vadd.f32 %v444_v14, %v372_v13  ;;  %v750_v16 = vpop.f32.mrb[1].mxu0 }
 0x22a   : > { %v448_v17 = vmax.f32 %v445_v15, 0.0 }
 0x22c   : > { %751 = vmatprep.subr.msk.mxu1 %vm490_vm4, %v448_v17 }
 0x22d   : > { %752 = vmatpush3.msk.msra.mxu1 %vm490_vm4, %v448_v17 }
 0x22e   : > { %754 = vmatmul.mubr.msk.f32.vlgmr.msra.gmra.mrb[0].mxu1 %vm477_vm3, %v450_v18 }
 0x22f   : > { %756 = vmatprep.mubr.msk.f32.mxu1 %vm477_vm3, %v451_v19 }
 0x232   : > { %757 = vmatmul.mubr.msk.f32.gmra.mrb[2].mxu1 %vm477_vm3, %v452_v20 }
 0x301   : > { %v755_v24 = vpop.f32.mrb[0].mxu1 }
 0x302   : > { %v566_v25 = vadd.f32 %v755_v24, %v465_v23  ;;  %v560_v26 = vpop.f32.mrb[1].mxu1 }
 0x303   : > { %v561_v27 = vadd.f32 %v560_v26, %v460_v21 }
 0x304   : > { %v723_v28 = vmul.f32 -1.442695, %v566_v25 }
 0x305   : > { %v722_v30 = vmul.f32 -1.442695, %v561_v27  ;;  %v758_v31 = vpop.f32.mrb[2].mxu1 }
 0x306   : > { %841 = vpow2.f32 %v723_v28  ;;  %v576_v32 = vadd.f32 %v758_v31, %v475_v29  ;;  %v570_v33 = vpop.f32.mrb[3].mxu1 }
 0x307   : > { %843 = vpow2.f32 %v722_v30  ;;  %v571_v34 = vadd.f32 %v570_v33, %v470_v22 }
 0x308   : > { %v725_v35 = vmul.f32 -1.442695, %v576_v32 }
 0x309   : > { %v724_v36 = vmul.f32 -1.442695, %v571_v34 }
 0x30a   : > { %845 = vpow2.f32 %v725_v35 }
 0x30b   : > { %847 = vpow2.f32 %v724_v36 }
 0x310   : > { %v842_v37 = vpop.eup %841 }
 0x311   : > { %v844_v38 = vpop.eup %843  ;;  %v592_v39 = vadd.f32 1.0, %v842_v37 }
 0x312   : > { %v591_v40 = vadd.f32 1.0, %v844_v38 }
 0x313   : > { %849 = vrcp.f32 %v592_v39 }
 0x314   : > { %v846_v41 = vpop.eup %845  ;;  %851 = vrcp.f32 %v591_v40 }
 0x315   : > { %v848_v42 = vpop.eup %847  ;;  %v594_v43 = vadd.f32 1.0, %v846_v41 }
 0x316   : > { %v593_v44 = vadd.f32 1.0, %v848_v42 }
 0x317   : > { %853 = vrcp.f32 %v594_v43 }
 0x318   : > { %855 = vrcp.f32 %v593_v44 }
 0x31d   : > { %v850_v45 = vpop.eup %849 }
 0x31e   : > { %v852_v46 = vpop.eup %851  ;;  %609 = vrot.lane.b32.xlu1 %v850_v45, %s948_s14 }
 0x31f   : > { %607 = vrot.lane.b32.xlu0 %v852_v46, %s948_s14 }
 0x321   : > { %v854_v47 = vpop.eup %853 }
 0x322   : > { %v856_v48 = vpop.eup %855  ;;  %613 = vrot.lane.b32.xlu1 %v854_v47, %s948_s14 }
 0x323   : > { %611 = vrot.lane.b32.xlu0 %v856_v48, %s948_s14 }
 0x390   : > { %v610_v49 = vpop.permute.xlu1 %609 }
 0x391   : > { %v620_v50 = vadd.f32 %v850_v45, %v610_v49  ;;  %v608_v51 = vpop.permute.xlu0 %607 }
 0x392   : > { %v619_v52 = vadd.f32 %v852_v46, %v608_v51 }
 0x393   : > { %624 = vst.msk [vmem:[%s261_s27 + $0x8] sm:$0xff] %vm266_vm0, %v620_v50 }
 0x394   : > { %623 = vst.msk [vmem:[%s261_s27] sm:$0xff] %vm266_vm0, %v619_v52  ;;  %v614_v53 = vpop.permute.xlu1 %613 }
 0x395   : > { %v622_v54 = vadd.f32 %v854_v47, %v614_v53  ;;  %v612_v55 = vpop.permute.xlu0 %611 }
 0x396   : > { %v621_v56 = vadd.f32 %v856_v48, %v612_v55 }
 0x397   : > { %626 = vst.msk [vmem:[%s261_s27 + $0x18] sm:$0xff] %vm266_vm0, %v622_v54 }
 0x398   : > { %625 = vst.msk [vmem:[%s261_s27 + $0x10] sm:$0xff] %vm266_vm0, %v621_v56 }
 0x399 PF: > { %s18_s23 = sadd.s32 1, %s937_s23   ;;  %s1170_s18 = smov %s921_s19 }
 0x39a   : > { %p15_p9 = scmp.ge.s32.totalorder %s18_s23, 4   ;;  %s1171_s19 = smov %s925_s20 }
 0x39b   : > { %s1172_s20 = smov %s1028_s30  ;;  %s1173_s21 = smov %s933_s22 }
 0x39c   : > { %s1174_s22 = smov %s1176_s25  ;;  %17 = sbr.rel (!%p15_p9) target bundleno = 4 (0x4), region = 88 }
 0x3a3   :  { %648 = vsyncpa [#allocation5], 1 }
 0x3a4   :  { %650 = vsyncpa [#allocation5 + $0x1], 1 }

</bundles_post_ra>
